<compile_context>
chip_gen: v6e
topology: v6e:2x2x1
jax: 0.10.0
libtpu: 0.0.40
codegen_flags: <defaults>
</compile_context>

<pallas_src>
import functools
import math

import jax
import jax.numpy as jnp
from jax.experimental import pallas as pl
from jax.experimental.pallas import tpu as pltpu


# ---------------- deterministic "parameters" of the module ------------------
MU = 0.3
SIGMA = 0.7
LAP_ALPHA = 0.5   # only used by the 'frac' branch (not implemented here)


# --------------------------- Pallas kernels ---------------------------------
def gauss0_kernel(x_ref, g0_ref, *, mu, inv_sigma2, norm_d, D):
    # x_ref: (D, T, ts)   g0_ref: (T, ts)
    s = (x_ref[0] - mu) ** 2
    for d in range(1, D):
        s = s + (x_ref[d] - mu) ** 2
    g0_ref[...] = norm_d * jnp.exp(-0.5 * inv_sigma2 * s)


def gauss1_kernel(x_ref, g1_ref, *, mu, inv_sigma2, norm_d, D):
    # x_ref: (D, T, ts)   g1_ref: (D, T, ts)
    diffs = [x_ref[d] - mu for d in range(D)]          # load each dim once
    s = diffs[0] * diffs[0]
    for d in range(1, D):
        s = s + diffs[d] * diffs[d]
    g0 = norm_d * jnp.exp(-0.5 * inv_sigma2 * s)       # single exp
    for k in range(D):
        g1_ref[k] = (-inv_sigma2) * diffs[k] * g0


def gauss2_kernel(x_ref, g2_ref, *, mu, inv_sigma2, norm_d, D):
    # x_ref: (D, T, ts)   g2_ref: (D, D, T, ts)
    diffs = [x_ref[d] - mu for d in range(D)]          # load each dim once
    s = diffs[0] * diffs[0]
    for d in range(1, D):
        s = s + diffs[d] * diffs[d]
    g0 = norm_d * jnp.exp(-0.5 * inv_sigma2 * s)       # single exp
    a = [(-inv_sigma2) * diffs[d] for d in range(D)]   # hoisted a-factors
    for k in range(D):
        g2_ref[k, k] = (a[k] * a[k] - inv_sigma2) * g0
        for j in range(k + 1, D):                      # Hessian symmetry
            v = a[k] * a[j] * g0
            g2_ref[k, j] = v
            g2_ref[j, k] = v


# ------------------------------ tiling ---------------------------------------
def _choose_ts(S, T, n_slabs, *, budget_bytes=24 << 20, max_ts=2048):
    """Largest lane tile (multiple of 128, dividing S) whose double-buffered
    f32 footprint (n_slabs (T, ts) slabs per grid step) fits the budget."""
    if S % 128 != 0:
        return S                                     # single full-width block
    per_lane_bytes = 2 * n_slabs * T * 4             # double-buffered bytes / lane
    cap = max(128, (budget_bytes // max(per_lane_bytes, 1)) // 128 * 128)
    best, ts = 128, 128
    limit = min(S, max_ts, cap)
    while ts <= limit:
        if S % ts == 0:
            best = ts
        ts += 128
    # keep >= 2 grid steps when possible (v7x has 2 TensorCores per chip)
    if best == S and S >= 256 and (S // 2) % 128 == 0:
        best = S // 2
    return best


# ------------------------------ wrapper ---------------------------------------
def gaussian_forward(x, diff_order=0, *, mu=MU, sigma=SIGMA, ts=None,
                     native_layout=False):
    """x: [T, S, D] float32.  Mirrors Gaussian.forward of the PyTorch module.

    Output shapes (native_layout=False, PyTorch convention):
      diff_order=0 -> [T, S]
      diff_order=1 -> [T, S, D]
      diff_order=2 -> [T, S, D, D]
    """
    T, S, D = x.shape
    x = x.astype(jnp.float32)

    if diff_order == "frac":
        # TODO(synk): LapGauss needs scipy.special.gamma / hyp1f1; no clean Pallas equivalent.
        raise NotImplementedError("fractional Laplacian branch not implemented")
    if diff_order not in (0, 1, 2):
        raise RuntimeError(
            "higher order derivatives of the gaussian has not bee implemented!"
        )

    inv_sigma2 = 1.0 / (sigma * sigma)                 # constant-folded
    norm = 1.0 / (sigma * math.sqrt(2.0 * math.pi))
    kw = dict(mu=float(mu), inv_sigma2=float(inv_sigma2),
              norm_d=float(norm ** D), D=D)

    out_slabs = {0: 1, 1: D, 2: D * D}[diff_order]
    if ts is None:
        ts = _choose_ts(S, T, D + out_slabs)
    assert S % ts == 0, "lane tile ts must evenly divide the samples axis S"

    # samples -> lane axis: kernel layout is (D, T, S)
    if D == 1:
        x_t = x.reshape(1, T, S)                       # free (pure reshape)
    else:
        x_t = jnp.transpose(x, (2, 0, 1))              # one HBM pass (D > 1 only)

    grid = (S // ts,)
    x_spec = pl.BlockSpec((D, T, ts), lambda i: (0, 0, i))
    cparams = pltpu.CompilerParams(
        dimension_semantics=("parallel",),
        vmem_limit_bytes=40 * 1024 * 1024,             # safe on v5e/v6e/v7x
    )

    if diff_order == 0:
        out = pl.pallas_call(
            functools.partial(gauss0_kernel, **kw),
            out_shape=jax.ShapeDtypeStruct((T, S), jnp.float32),
            grid=grid,
            in_specs=[x_spec],
            out_specs=pl.BlockSpec((T, ts), lambda i: (0, i)),
            compiler_params=cparams,
        )(x_t)
        return out                                     # [T, S]

    if diff_order == 1:
        out = pl.pallas_call(
            functools.partial(gauss1_kernel, **kw),
            out_shape=jax.ShapeDtypeStruct((D, T, S), jnp.float32),
            grid=grid,
            in_specs=[x_spec],
            out_specs=pl.BlockSpec((D, T, ts), lambda i: (0, 0, i)),
            compiler_params=cparams,
        )(x_t)
        if native_layout:
            return out                                 # (D, T, S)
        if D == 1:
            return out.reshape(T, S, 1)                # free reshape
        return jnp.transpose(out, (1, 2, 0))           # [T, S, D]

    # diff_order == 2
    out = pl.pallas_call(
        functools.partial(gauss2_kernel, **kw),
        out_shape=jax.ShapeDtypeStruct((D, D, T, S), jnp.float32),
        grid=grid,
        in_specs=[x_spec],
        out_specs=pl.BlockSpec((D, D, T, ts), lambda i: (0, 0, 0, i)),
        compiler_params=cparams,
    )(x_t)
    if native_layout:
        return out                                     # (D, D, T, S)
    if D == 1:
        return out.reshape(T, S, 1, 1)                 # free reshape
    return jnp.transpose(out, (2, 3, 0, 1))            # [T, S, D, D]


# ------------------------------ reference ------------------------------------
def _ref_forward(x, diff_order, mu=MU, sigma=SIGMA):
    gB = lambda xd: 1.0 / (sigma * jnp.sqrt(2.0 * jnp.pi)) * jnp.exp(
        -0.5 * (xd - mu) ** 2 / sigma ** 2
    )
    g0 = jnp.prod(gB(x), axis=2)
    if diff_order == 0:
        return g0
    if diff_order == 1:
        return -(x - mu) / sigma ** 2 * g0[:, :, None]
    if diff_order == 2:
        a = -(x - mu) / sigma ** 2                     # [T,S,D]
        outer = a[:, :, :, None] * a[:, :, None, :]
        eye = jnp.eye(x.shape[2], dtype=x.dtype)
        return (outer - eye / sigma ** 2) * g0[:, :, None, None]
    raise ValueError


if __name__ == "__main__":
    key = jax.random.PRNGKey(0)
    T, S = 8, 256            # time steps, samples

    ok = True
    for D in (1, 2):         # module uses dim=1; also check the generic-D path
        x = jax.random.normal(jax.random.fold_in(key, D), (T, S, D),
                              dtype=jnp.float32)
        for order in (0, 1, 2):
            out = jax.block_until_ready(gaussian_forward(x, diff_order=order))
            ref = _ref_forward(x, order)
            ok &= bool(jnp.allclose(out, ref, atol=1e-5, rtol=1e-5))

    if ok:
        print("KERNEL_OK")
    else:
        print("KERNEL_MISMATCH")
</pallas_src>

<mosaic_0001>
module attributes {stable_mosaic.version = 11 : i64} {
  func.func @gauss0_kernel(%arg0: i32, %arg1: memref<1x8x128xf32, #tpu.memory_space<vmem>>, %arg2: memref<8x128xf32, #tpu.memory_space<vmem>>) attributes {dimension_semantics = [#tpu.dimension_semantics<parallel>], iteration_bounds = array<i64: 2>, scalar_prefetch = 0 : i64, scratch_operands = 0 : i64, tpu.core_type = #tpu.core_type<tc>, window_params = [{transform_indices = @transform_0, window_bounds = array<i64: 1, 8, 128>}, {transform_indices = @transform_1, window_bounds = array<i64: 8, 128>}]} {
    %c0 = arith.constant 0 : index
    %c0_0 = arith.constant 0 : index
    %c0_1 = arith.constant 0 : index
    %0 = vector.load %arg1[%c0, %c0_0, %c0_1] : memref<1x8x128xf32, #tpu.memory_space<vmem>>, vector<1x8x128xf32>
    %1 = vector.shape_cast %0 : vector<1x8x128xf32> to vector<8x128xf32>
    %cst = arith.constant 3.000000e-01 : f32
    %2 = vector.broadcast %cst : f32 to vector<8x128xf32>
    %3 = arith.subf %1, %2 : vector<8x128xf32>
    %4 = arith.mulf %3, %3 : vector<8x128xf32>
    %cst_2 = arith.constant -1.02040815 : f32
    %5 = vector.broadcast %cst_2 : f32 to vector<8x128xf32>
    %6 = arith.mulf %5, %4 : vector<8x128xf32>
    %7 = math.exp %6 : vector<8x128xf32>
    %cst_3 = arith.constant 0.56991756 : f32
    %8 = vector.broadcast %cst_3 : f32 to vector<8x128xf32>
    %9 = arith.mulf %8, %7 : vector<8x128xf32>
    %c0_4 = arith.constant 0 : index
    %c0_5 = arith.constant 0 : index
    %10 = vector.load %arg2[%c0_4, %c0_5] : memref<8x128xf32, #tpu.memory_space<vmem>>, vector<8x128xf32>
    tpu.vector_store %arg2[%c0_4, %c0_5], %9 {strides = array<i32>} : memref<8x128xf32, #tpu.memory_space<vmem>>, vector<8x128xf32>,
    return
  }
  func.func @transform_0(%arg0: i32) -> (i32, i32, i32) {
    %c0_i32 = arith.constant 0 : i32
    %c0_i32_0 = arith.constant 0 : i32
    %c0_i32_1 = arith.constant 0 : i32
    return %c0_i32, %c0_i32_0, %arg0 : i32, i32, i32
  }
  func.func @transform_1(%arg0: i32) -> (i32, i32) {
    %c0_i32 = arith.constant 0 : i32
    %c0_i32_0 = arith.constant 0 : i32
    return %c0_i32, %arg0 : i32, i32
  }
}

</mosaic_0001>

<bundles_post_ra>
// kernel: tpu_custom_call.1
= control target key start
LH: loop header
LB: loop body
LE: loop exit
PB: predicated region body
PF: predicated region fallthrough
CT: control target
= control target key end

     0   :  { %6 = vsyncpa [#allocation3], 0  ;;  %s532_s0 = inlined_call_operand.hbm [shape: f32[1,8,256], index: 0, kind: input, shape index: {}]   ;;  %s533_s1 = inlined_call_operand.hbm [shape: f32[8,256], index: 1, kind: output, shape index: {}]  }
   0x1   :  { %8 = vsyncpa [#allocation3 + $0x1], 0 }
   0x2   :  { %9 = vsyncpa [#allocation4], 0 }
   0x3   :  { %11 = vsyncpa [#allocation4 + $0x1], 0  ;;  %s391_s6 = smov 0   ;;  %s393_s7 = smov 0  }
   0x4   :  { %s395_s8 = smov 0   ;;  %s397_s9 = smov 0  }
   0x5 LB: > { %s412_s10 = sadd.s32 4294967295, %s377_s9   ;;  %s224_s11 = sadd.s32 4294967294, %s377_s9   ;;  %s377_s9 = sphi %s397_s9, %s550_s9   ;;  %s373_s8 = sphi %s395_s8, %s549_s8   ;;  %s369_s7 = sphi %s393_s7, %s548_s7   ;;  %s365_s6 = sphi %s391_s6, %s547_s6  }
   0x6   : > { %s416_s12 = sadd.s32 1, %s377_s9   ;;  %s24_s13 = sadd.s32 1, %s373_s8 }
   0x7   : > { %s21_s14 = ssub.s32 %s377_s9, %s416_s12  ;;  %p31_p0 = scmp.ne.s32.totalorder %s373_s8, %s369_s7 }
   0x8   : > { %p22_p1 = scmp.eq.s32.totalorder %s21_s14, 0  ;;  %p32_p2 = scmp.eq.s32.totalorder %s377_s9, 0 }
   0x9   : > { %p37_p3 = scmp.ne.s32.totalorder %s369_s7, %s365_s6  ;;  %p38_p4 = scmp.eq.s32.totalorder %s412_s10, 0 }
   0xa   : > { %s428_s15 = scalar_select %p22_p1, %s373_s8, %s24_s13  }
   0xb   : > { %p430_p5 = por %p32_p2, %p31_p0  ;;  %p434_p6 = por %p38_p4, %p37_p3 }
   0xc   : > { %p61_p7 = scmp.eq.s32.totalorder %s412_s10, 1  ;;  %p67_p8 = scmp.eq.s32.totalorder %s224_s11, 1 }
   0xd   : > { %s537_s17 = scalar_select %p434_p6, 1, 0 }
   0xe   : > { %p249_p10 = scmp.lt.s32.totalorder %s377_s9, 2  ;;  %p441_p11 = por %p61_p7, %p31_p0 }
   0xf   : > { %p445_p12 = por %p67_p8, %p37_p3  ;;  %s87_s20 = sand.u32 1, %s373_s8  }
  0x10   : > { %s538_s18 = scalar_select %p441_p11, 1, 0 }
  0x11   : > { %s539_s19 = scalar_select %p445_p12, 1, 0 }
  0x12   : > { %s228_s21 = sshll.u32 %s377_s9, 7  ;;  %s227_s22 = sshll.u32 %s87_s20, 3 }
  0x13   : > { %s454_s25 = scalar_lea.hbm %s532_s0, %s228_s21  ;;  %s91_s26 = scalar_lea.vmem [#allocation2], %s227_s22 }
  0x14   : > { %s98_s27 = sshll.u32 %s91_s26, 4  ;;  %p458_p13 = pnand %p249_p10, %p430_p5  ;;  %s462_s27 = int_to_ptr.vmem [resolvable:$true] %s98_s27 }
  0x15   : > { %s88_s29 = scalar_lea.sflag [#allocation3], %s87_s20  ;;  %s285_s30 = scalar_lea.hbm %s454_s25, 128 }
  0x16   : > { %p286_p2 = scmp.ne.s32.totalorder %s454_s25, %s285_s30  ;;  %p287_p3 = pneg %p458_p13 }
  0x17   : > { %s290_s4 = scalar_lea.hbm %s532_s0, 256  ;;  %p291_p5 = scmp.lt.s32.totalorder %s454_s25, %s532_s0 }
  0x18   : > { %p288_p4 = pnand %p287_p3, %p286_p2  ;;  %p292_p8 = scmp.lt.s32.totalorder %s290_s4, %s285_s30 }
  0x1a   : > { %p289_p7 = pneg %p288_p4  ;;  %p293_p10 = por %p292_p8, %p291_p5 }
  0x1c   : > { %p294_p9 = pnand %p293_p10, %p289_p7 }
  0x1e   : > { %297 = shalt.err (!%p294_p9)
}
  0x1f   : > { %s298_s13 = scalar_lea.vmem %s462_s27, 128  ;;  %s379_s14 = smov [#allocation2]  }
  0x20   : > { %p299_p0 = scmp.ne.s32.totalorder %s462_s27, %s298_s13  ;;  %s303_s16 = sshll.u32 %s379_s14, 4  ;;  %s304_s16 = int_to_ptr.vmem [resolvable:$false] %s303_s16 }
  0x21   : > { %s305_s20 = scalar_lea.vmem %s304_s16, 256  ;;  %p306_p4 = scmp.lt.s32.totalorder %s462_s27, %s304_s16 }
  0x22   : > { %p301_p1 = pnand %p299_p0, %p287_p3  ;;  %p307_p12 = scmp.lt.s32.totalorder %s305_s20, %s298_s13 }
  0x24   : > { %p302_p2 = pneg %p301_p1  ;;  %p308_p11 = por %p307_p12, %p306_p4 }
  0x26   : > { %p309_p6 = pnand %p308_p11, %p302_p2 }
  0x28   : > { %312 = shalt.err (!%p309_p6)
}
  0x29   : > { %244 = dma.hbm_to_vmem [thread:$0]  (!%p458_p13), %s454_s25, 128, %s462_s27, %s88_s29  }
  0x2a   : > { %p541_p9 = scmp.lt.s32.totalorder %s377_s9, 3  ;;  %p542_p7 = scmp.ge.s32.totalorder %s377_s9, 1 }
  0x2c   : > { %p104_p0 = pnand %p542_p7, %p541_p9 }
  0x2d   : > { %s489_s21 = sand.u32 (!%p104_p0), 1, %s369_s7   ;;  %p543_p6 = scmp.ne.s32.totalorder (!%p104_p0), %s537_s17, 0 }
  0x2e   : > { %107 = sbr.rel (%p104_p0) target bundleno = 90 (0x5a), region = 24  ;;  %s230_s22 = sshll.u32 (!%p104_p0), %s489_s21, 3 }
  0x2f   : > { %s110_s23 = scalar_lea.sflag (!%p104_p0), [#allocation3], %s489_s21  ;;  %s113_s24 = scalar_lea.vmem (!%p104_p0), [#allocation2], %s230_s22 }
  0x33   : > { %356 = dma.done.wait (%p543_p6), %s110_s23, 128  }
  0x34   : > { %358 = vsyncadd (%p543_p6), %s110_s23, 4294967168  ;;  %v132_v0 = vld [vmem:[%s113_s24] sm:$0xff]  ;;  %s131_s25 = scalar_lea.vmem [#allocation5], %s230_s22  ;;  %s234_s27 = sshll.u32 %s412_s10, 7 }
  0x35   : > { %v232_v1 = vadd.f32 -0.3, %v132_v0  ;;  %s154_s26 = sshll.u32 %s131_s25, 4  ;;  %s152_s17 = scalar_lea.hbm %s533_s1, %s234_s27  ;;  %s155_s26 = int_to_ptr.vmem [resolvable:$true] %s154_s26 }
  0x36   : > { %s141_s30 = scalar_lea.sflag [#allocation4], %s489_s21  ;;  %s313_s2 = scalar_lea.vmem %s155_s26, 128 }
  0x37   : > { %v134_v2 = vmul.f32 %v232_v1, %v232_v1  ;;  %p314_p11 = scmp.ne.s32.totalorder %s155_s26, %s313_s2  ;;  %p544_p12 = scmp.ne.s32.totalorder %s538_s18, 0 }
  0x38   : > { %s380_s3 = smov [#allocation5]  }
  0x39   : > { %v135_v3 = vmul.f32 -1.0204082, %v134_v2  ;;  %p315_p13 = pnand %p314_p11, %p544_p12  ;;  %s317_s4 = sshll.u32 %s380_s3, 4  ;;  %s318_s4 = int_to_ptr.vmem [resolvable:$false] %s317_s4 }
  0x3a   : > { %s319_s5 = scalar_lea.vmem %s318_s4, 256  ;;  %p320_p3 = scmp.lt.s32.totalorder %s155_s26, %s318_s4 }
  0x3b   : > { %v136_v4 = vmul.f32 1.442695, %v135_v3  ;;  %p316_p1 = pneg %p315_p13  ;;  %p321_p5 = scmp.lt.s32.totalorder %s319_s5, %s313_s2 }
  0x3d   : > { %283 = vpow2.f32 %v136_v4  ;;  %p322_p8 = por %p321_p5, %p320_p3 }
  0x3f   : > { %p323_p10 = pnand %p322_p8, %p316_p1 }
  0x4a   : > { %v284_v5 = vpop.eup %283 }
  0x4b   : > { %v138_v6 = vmul.f32 0.56991756, %v284_v5 }
  0x4d   : > { %139 = vst [vmem:[%s131_s25] sm:$0xff] %v138_v6 }
  0x4e   : > { %326 = shalt.err (!%p323_p10)
}
  0x4f   : > { %s327_s10 = scalar_lea.hbm %s152_s17, 128  ;;  %s331_s14 = scalar_lea.hbm %s533_s1, 256 }
  0x50   : > { %p328_p2 = scmp.ne.s32.totalorder %s152_s17, %s327_s10  ;;  %p332_p7 = scmp.lt.s32.totalorder %s152_s17, %s533_s1 }
  0x51   : > { %p333_p0 = scmp.lt.s32.totalorder %s331_s14, %s327_s10 }
  0x52   : > { %p329_p4 = pnand %p328_p2, %p544_p12 }
  0x53   : > { %p334_p6 = por %p333_p0, %p332_p7 }
  0x54   : > { %p330_p9 = pneg %p329_p4 }
  0x56   : > { %p335_p11 = pnand %p334_p6, %p330_p9 }
  0x58   : > { %338 = shalt.err (!%p335_p11)
}
  0x59   : > { %239 = dma.vmem_to_hbm [thread:$0]  (%p544_p12), %s155_s26, 128, %s152_s17, %s141_s30  }
  0x5a PF: > { %s166_s21 = sand.u32 1, %s365_s6   ;;  %p545_p13 = scmp.ne.s32.totalorder %s539_s19, 0 }
  0x5b   : > { %p546_p1 = scmp.ge.s32.totalorder %s377_s9, 2  ;;  %s167_s22 = scalar_lea.sflag [#allocation4], %s166_s21 }
  0x5d   : > { %p246_p3 = pnand %p546_p1, %p545_p13 }
  0x5f   : > { %p247_p5 = pneg %p246_p3 }
  0x61   : > { %360 = dma.done.wait (%p247_p5), %s167_s22, 128  }
  0x62   : > { %362 = vsyncadd (%p247_p5), %s167_s22, 4294967168  ;;  %p14_p8 = scmp.ge.s32.totalorder %s416_s12, 4   ;;  %s547_s6 = smov %s369_s7 }
  0x63   : > { %s548_s7 = smov %s373_s8  ;;  %s549_s8 = smov %s428_s15 }
  0x64   : > { %s550_s9 = smov %s416_s12  ;;  %16 = sbr.rel (!%p14_p8) target bundleno = 5 (0x5), region = 69 }
  0x69   :  { %172 = vsyncpa [#allocation3], 1 }
  0x6a   :  { %174 = vsyncpa [#allocation3 + $0x1], 1 }
  0x6b   :  { %175 = vsyncpa [#allocation4], 1 }
  0x6c   :  { %177 = vsyncpa [#allocation4 + $0x1], 1 }

</bundles_post_ra>
